<compile_context>
chip_gen: v7x
topology: tpu7x:2x2x1
jax: 0.10.0
libtpu: 0.0.40
codegen_flags: <defaults>
</compile_context>

<pallas_src>
import functools

import jax
import jax.numpy as jnp
from jax.experimental import pallas as pl
from jax.experimental.pallas import tpu as pltpu


def _round_up(x, m):
    return ((x + m - 1) // m) * m


def _round_down(x, m):
    return (x // m) * m


@functools.lru_cache(maxsize=None)
def _tpu_vmem_bytes():
    """Physical VMEM per TensorCore (best-effort query, conservative fallback)."""
    try:
        info = pltpu.get_tpu_info()
        for attr in ("vmem_capacity_bytes", "vmem_bytes", "vmem_size_bytes"):
            v = getattr(info, attr, None)
            if v:
                return int(v)
    except Exception:
        pass
    return 64 << 20  # v7x per-core VMEM; conservative for v5e/v6e (128 MiB)


@functools.lru_cache(maxsize=None)
def _num_tensorcores():
    """TensorCores per chip (v7x: 2, v5e/v6e: 1). Defaults to 1 if unknown."""
    try:
        info = pltpu.get_tpu_info()
        for attr in ("num_cores", "core_count", "num_tensorcores", "tensorcore_count"):
            v = getattr(info, attr, None)
            if v:
                return int(v)
    except Exception:
        pass
    try:
        v = getattr(jax.devices()[0], "num_cores", None)
        if v:
            return int(v)
    except Exception:
        pass
    return 1


def _conv1x1_bn_relu_kernel(x_ref, w_ref, bias_ref, o_ref):
    # x_ref:    (NB, C_in, THW)  tile of flattened pixels (lane dim = HW)
    # w_ref:    (C_out, C_in)    BN-scale-folded 1x1 conv weight (VMEM-resident)
    # bias_ref: (C_out, 1)       folded BN bias (f32)
    # o_ref:    (NB, C_out, THW) lane-dense output tile
    w = w_ref[...]
    bias = bias_ref[...]
    for i in range(x_ref.shape[0]):  # NB <= 8: static unroll of tiny 2-D matmuls
        y = jnp.dot(w, x_ref[i], preferred_element_type=jnp.float32)
        o_ref[i] = jnp.maximum(y + bias, 0.0).astype(o_ref.dtype)


@functools.partial(jax.jit, static_argnames=("thw",))
def dim_redu_conv_layer(x, w, gamma, beta, running_mean, running_var,
                        eps=1e-5, thw=None):
    """Forward of DimReduConvLayer (eval-mode BN).

    x: (N, C_in, H, W) f32 or bf16 (NCHW, like PyTorch)
    w: (C_out, C_in, 1, 1) 1x1 conv weight, no bias
    gamma/beta/running_mean/running_var: (C_out,) BatchNorm2d params
    returns: (N, C_out, H, W) in x.dtype
    """
    n, c_in, h, wd = x.shape
    c_out = w.shape[0]
    hw = h * wd
    dtype_bytes = jnp.dtype(x.dtype).itemsize

    # ---- per-generation VMEM budget for the double-buffered x + y tiles ----
    phys_vmem = _tpu_vmem_bytes()            # 64 MiB on v7x, 128 MiB on v5e/v6e
    budget = min(phys_vmem // 3, 24 << 20)   # ~21 MiB on v7x, 24 MiB otherwise

    hw_128 = _round_up(hw, 128)
    per_lane_bytes = 2 * dtype_bytes * (c_in + c_out)  # double-buffered x+y per lane
    thw_cap = max(128, _round_down(budget // per_lane_bytes, 128))

    if thw is None:
        thw = min(hw_128, thw_cap, 8192)
        # Dual-TensorCore chips (v7x): with a single batch element, split HW so both
        # cores get a 'parallel' grid step; keep split tiles >= 512 lanes.
        # Single-TC chips (v5e/v6e) skip this: splitting only adds per-step overhead.
        if n == 1 and _num_tensorcores() >= 2 and hw_128 >= 1024:
            half = _round_up(pl.cdiv(hw_128, 2), 128)
            thw = min(thw, max(512, half))

    # ---- batch blocking: amortize ~0.35us/step overhead when HW is small ----
    nb = 1
    if n > 1 and thw >= hw_128:
        step_bytes = dtype_bytes * (c_in + c_out) * thw  # x+y bytes per image per step
        nb = max(1, min(n, 8,
                        (1 << 20) // max(step_bytes, 1),
                        budget // max(2 * step_bytes, 1)))
        while n % nb:  # keep the batch grid axis exactly divisible
            nb -= 1

    # ---- glue (free / tiny): NCHW reshape + BN folding into the weight ----
    x3d = x.reshape(n, c_in, hw)                              # free reshape, no transpose
    w2d = w.reshape(c_out, c_in).astype(jnp.float32)
    inv_std = jax.lax.rsqrt(running_var.astype(jnp.float32) + eps)
    scale = gamma.astype(jnp.float32) * inv_std               # (C_out,)
    w_scaled = (w2d * scale[:, None]).astype(x.dtype)         # fold in f32, then cast
    bias = (beta.astype(jnp.float32)
            - running_mean.astype(jnp.float32) * scale)[:, None]  # (C_out, 1) f32

    grid = (n // nb, pl.cdiv(hw, thw))  # partial last HW tile handled by Pallas

    vmem_limit = int(min(phys_vmem, budget + (8 << 20)))
    flops = 2 * n * c_out * c_in * hw
    bytes_accessed = (dtype_bytes * n * hw * (c_in + c_out)
                      + dtype_bytes * c_out * c_in + 4 * c_out)

    y3d = pl.pallas_call(
        _conv1x1_bn_relu_kernel,
        out_shape=jax.ShapeDtypeStruct((n, c_out, hw), x.dtype),
        grid_spec=pltpu.PrefetchScalarGridSpec(
            num_scalar_prefetch=0,
            grid=grid,
            in_specs=[
                pl.BlockSpec((nb, c_in, thw), lambda b, j: (b, 0, j)),
                pl.BlockSpec((c_out, c_in), lambda b, j: (0, 0)),
                pl.BlockSpec((c_out, 1), lambda b, j: (0, 0)),
            ],
            out_specs=pl.BlockSpec((nb, c_out, thw), lambda b, j: (b, 0, j)),
        ),
        compiler_params=pltpu.CompilerParams(
            dimension_semantics=("parallel", "parallel"),
            vmem_limit_bytes=vmem_limit),
        cost_estimate=pl.CostEstimate(
            flops=flops, transcendentals=0, bytes_accessed=bytes_accessed),
    )(x3d, w_scaled, bias)

    return y3d.reshape(n, c_out, h, wd)  # free reshape back to NCHW


def _reference(x, w, gamma, beta, running_mean, running_var, eps=1e-5):
    # Pure-JAX reference: 1x1 conv (NCHW) + eval-mode BN + ReLU, all in f32.
    y = jnp.einsum("nihw,oi->nohw", x, w.reshape(w.shape[0], w.shape[1]))
    inv_std = 1.0 / jnp.sqrt(running_var + eps)
    scale = (gamma * inv_std)[None, :, None, None]
    bias = (beta - running_mean * gamma * inv_std)[None, :, None, None]
    return jnp.maximum(y * scale + bias, 0.0)


if __name__ == "__main__":
    key = jax.random.PRNGKey(0)
    k_x, k_w, k_g, k_b, k_m, k_v = jax.random.split(key, 6)

    C_IN, C_OUT = 4, 8
    # Conv2d(inc, outc, 1, 1, 0, bias=False) weight: (outc, inc, 1, 1)
    w = jax.random.normal(k_w, (C_OUT, C_IN, 1, 1), dtype=jnp.float32) * 0.5
    # BatchNorm2d(outc) params (deterministic, nontrivial)
    gamma = 1.0 + 0.1 * jax.random.normal(k_g, (C_OUT,), dtype=jnp.float32)
    beta = 0.1 * jax.random.normal(k_b, (C_OUT,), dtype=jnp.float32)
    running_mean = 0.1 * jax.random.normal(k_m, (C_OUT,), dtype=jnp.float32)
    running_var = 1.0 + 0.1 * jax.random.uniform(k_v, (C_OUT,), dtype=jnp.float32)

    # --- case 1: canonical small test (exercises batch-blocking path) ---
    N, H, W = 2, 16, 16
    x = jax.random.normal(k_x, (N, C_IN, H, W), dtype=jnp.float32)
    out = jax.block_until_ready(
        dim_redu_conv_layer(x, w, gamma, beta, running_mean, running_var))
    ref = _reference(x, w, gamma, beta, running_mean, running_var)
    assert out.shape == (N, C_OUT, H, W)
    assert jnp.allclose(out, ref, atol=1e-5, rtol=1e-5), "case1 mismatch"

    # --- case 2: HW not a multiple of 128 (partial lane tile, no pad/slice) ---
    x2 = jax.random.normal(k_x, (1, C_IN, 10, 10), dtype=jnp.float32)
    out2 = jax.block_until_ready(
        dim_redu_conv_layer(x2, w, gamma, beta, running_mean, running_var))
    ref2 = _reference(x2, w, gamma, beta, running_mean, running_var)
    assert out2.shape == (1, C_OUT, 10, 10)
    assert jnp.allclose(out2, ref2, atol=1e-5, rtol=1e-5), "case2 mismatch"

    # --- case 3: larger single-image HW (multi-tile / core-split path) ---
    x3 = jax.random.normal(k_x, (1, C_IN, 40, 40), dtype=jnp.float32)
    out3 = jax.block_until_ready(
        dim_redu_conv_layer(x3, w, gamma, beta, running_mean, running_var))
    ref3 = _reference(x3, w, gamma, beta, running_mean, running_var)
    assert jnp.allclose(out3, ref3, atol=1e-5, rtol=1e-5), "case3 mismatch"

    # --- case 4: bf16 data path (halves HBM bytes for this mem-bound op) ---
    xb = x.astype(jnp.bfloat16)
    outb = jax.block_until_ready(
        dim_redu_conv_layer(xb, w, gamma, beta, running_mean, running_var))
    refb = _reference(xb.astype(jnp.float32), w, gamma, beta, running_mean, running_var)
    assert outb.dtype == jnp.bfloat16
    assert jnp.allclose(outb.astype(jnp.float32), refb, atol=0.1, rtol=0.05), "bf16 mismatch"

    print("KERNEL_OK")
</pallas_src>

<mosaic_0001>
module attributes {stable_mosaic.version = 11 : i64} {
  func.func @_conv1x1_bn_relu_kernel(%arg0: i32, %arg1: i32, %arg2: memref<2x4x256xf32, #tpu.memory_space<vmem>>, %arg3: memref<8x4xf32, #tpu.memory_space<vmem>>, %arg4: memref<8x1xf32, #tpu.memory_space<vmem>>, %arg5: memref<2x8x256xf32, #tpu.memory_space<vmem>>) attributes {dimension_semantics = [#tpu.dimension_semantics<parallel>, #tpu.dimension_semantics<parallel>], iteration_bounds = array<i64: 1, 1>, scalar_prefetch = 0 : i64, scratch_operands = 0 : i64, tpu.core_type = #tpu.core_type<tc>, window_params = [{transform_indices = @transform_0, window_bounds = array<i64: 2, 4, 256>}, {pipeline_mode = #tpu.pipeline_mode<synchronous>, transform_indices = @transform_1, window_bounds = array<i64: 8, 4>}, {pipeline_mode = #tpu.pipeline_mode<synchronous>, transform_indices = @transform_2, window_bounds = array<i64: 8, 1>}, {transform_indices = @transform_3, window_bounds = array<i64: 2, 8, 256>}]} {
    %c0 = arith.constant 0 : index
    %c0_0 = arith.constant 0 : index
    %0 = vector.load %arg3[%c0, %c0_0] : memref<8x4xf32, #tpu.memory_space<vmem>>, vector<8x4xf32>
    %c0_1 = arith.constant 0 : index
    %c0_2 = arith.constant 0 : index
    %1 = vector.load %arg4[%c0_1, %c0_2] : memref<8x1xf32, #tpu.memory_space<vmem>>, vector<8x1xf32>
    %c0_3 = arith.constant 0 : index
    %c0_4 = arith.constant 0 : index
    %c0_5 = arith.constant 0 : index
    %2 = vector.load %arg2[%c0_3, %c0_4, %c0_5] : memref<2x4x256xf32, #tpu.memory_space<vmem>>, vector<1x4x256xf32>
    %3 = vector.shape_cast %2 : vector<1x4x256xf32> to vector<4x256xf32>
    %cst = arith.constant dense<0.000000e+00> : vector<8x256xf32>
    %4 = tpu.matmul %0, %3, %cst {dimension_numbers = #tpu.dot_dimension_numbers<[1], [0], [0], [1], [0, 0, 1, 1], [], []>} : vector<8x4xf32>, vector<4x256xf32>, vector<8x256xf32> -> vector<8x256xf32>
    %5 = vector.broadcast %1 : vector<8x1xf32> to vector<8x256xf32>
    %6 = arith.addf %4, %5 : vector<8x256xf32>
    %cst_6 = arith.constant 0.000000e+00 : f32
    %7 = vector.broadcast %cst_6 : f32 to vector<8x256xf32>
    %8 = arith.maximumf %6, %7 : vector<8x256xf32>
    %c0_7 = arith.constant 0 : index
    %c0_8 = arith.constant 0 : index
    %c0_9 = arith.constant 0 : index
    %9 = vector.load %arg5[%c0_7, %c0_8, %c0_9] : memref<2x8x256xf32, #tpu.memory_space<vmem>>, vector<1x8x256xf32>
    %10 = vector.shape_cast %9 : vector<1x8x256xf32> to vector<8x256xf32>
    %11 = vector.shape_cast %8 : vector<8x256xf32> to vector<1x8x256xf32>
    tpu.vector_store %arg5[%c0_7, %c0_8, %c0_9], %11 {strides = array<i32>} : memref<2x8x256xf32, #tpu.memory_space<vmem>>, vector<1x8x256xf32>,
    %c1 = arith.constant 1 : index
    %c0_10 = arith.constant 0 : index
    %c0_11 = arith.constant 0 : index
    %12 = vector.load %arg2[%c1, %c0_10, %c0_11] : memref<2x4x256xf32, #tpu.memory_space<vmem>>, vector<1x4x256xf32>
    %13 = vector.shape_cast %12 : vector<1x4x256xf32> to vector<4x256xf32>
    %cst_12 = arith.constant dense<0.000000e+00> : vector<8x256xf32>
    %14 = tpu.matmul %0, %13, %cst_12 {dimension_numbers = #tpu.dot_dimension_numbers<[1], [0], [0], [1], [0, 0, 1, 1], [], []>} : vector<8x4xf32>, vector<4x256xf32>, vector<8x256xf32> -> vector<8x256xf32>
    %15 = vector.broadcast %1 : vector<8x1xf32> to vector<8x256xf32>
    %16 = arith.addf %14, %15 : vector<8x256xf32>
    %cst_13 = arith.constant 0.000000e+00 : f32
    %17 = vector.broadcast %cst_13 : f32 to vector<8x256xf32>
    %18 = arith.maximumf %16, %17 : vector<8x256xf32>
    %c1_14 = arith.constant 1 : index
    %c0_15 = arith.constant 0 : index
    %c0_16 = arith.constant 0 : index
    %19 = vector.load %arg5[%c1_14, %c0_15, %c0_16] : memref<2x8x256xf32, #tpu.memory_space<vmem>>, vector<1x8x256xf32>
    %20 = vector.shape_cast %19 : vector<1x8x256xf32> to vector<8x256xf32>
    %21 = vector.shape_cast %18 : vector<8x256xf32> to vector<1x8x256xf32>
    tpu.vector_store %arg5[%c1_14, %c0_15, %c0_16], %21 {strides = array<i32>} : memref<2x8x256xf32, #tpu.memory_space<vmem>>, vector<1x8x256xf32>,
    return
  }
  func.func @transform_0(%arg0: i32, %arg1: i32) -> (i32, i32, i32) {
    %c0_i32 = arith.constant 0 : i32
    %c0_i32_0 = arith.constant 0 : i32
    return %arg0, %c0_i32, %arg1 : i32, i32, i32
  }
  func.func @transform_1(%arg0: i32, %arg1: i32) -> (i32, i32) {
    %c0_i32 = arith.constant 0 : i32
    %c0_i32_0 = arith.constant 0 : i32
    %c0_i32_1 = arith.constant 0 : i32
    return %c0_i32, %c0_i32_0 : i32, i32
  }
  func.func @transform_2(%arg0: i32, %arg1: i32) -> (i32, i32) {
    %c0_i32 = arith.constant 0 : i32
    %c0_i32_0 = arith.constant 0 : i32
    %c0_i32_1 = arith.constant 0 : i32
    return %c0_i32, %c0_i32_0 : i32, i32
  }
  func.func @transform_3(%arg0: i32, %arg1: i32) -> (i32, i32, i32) {
    %c0_i32 = arith.constant 0 : i32
    %c0_i32_0 = arith.constant 0 : i32
    return %arg0, %c0_i32, %arg1 : i32, i32, i32
  }
}

</mosaic_0001>

<bundles_post_ra>
// kernel: dim_redu_conv_layer.1
= control target key start
LH: loop header
LB: loop body
LE: loop exit
PB: predicated region body
PF: predicated region fallthrough
CT: control target
= control target key end

     0   :  { %vm28_vm0 = vcmask 1043456   ;;  %v210_v2 = vmov 0.0   ;;  %v211_v5 = vmov 0   ;;  %vm24_vm1 = vcmask 31744   ;;  %s260_s0 = inlined_call_operand.vmem [shape: f32[2,4,256], index: 0, kind: input, shape index: {}]   ;;  %s261_s1 = inlined_call_operand.vmem [shape: f32[8,4], index: 1, kind: input, shape index: {}]   ;;  %s262_s2 = inlined_call_operand.vmem [shape: f32[8,1], index: 2, kind: input, shape index: {}]   ;;  %s263_s3 = inlined_call_operand.vmem [shape: f32[2,8,256], index: 3, kind: output, shape index: {}]  }
   0x1   :  { %v16_v0 = vld [vmem:[%s260_s0] sm:$0xff]  ;;  %v199_v1 = vld [vmem:[%s260_s0 + $0x8] sm:$0xff]  ;;  %97 = vmatprep.mubr.f32.mxu0 %v210_v2  ;;  %180 = vmatprep.mubr.f32.mxu1 %v210_v2 }
   0x2   :  { %v23_v3 = vcombine.high %v16_v0, %v16_v0  ;;  %v111_v4 = vcombine.high %v199_v1, %v199_v1  ;;  %207 = vset.pattern.permute.xlu0 %v211_v5  ;;  %v15_v6 = vld [vmem:[%s262_s2] sm:$0xff] }
   0x3   :  { %v14_v7 = vld [vmem:[%s261_s1] sm:$0xff]  ;;  %19 = vperm.xlu0 %207, %v15_v6  }
   0x4   :  { %196 = vmatprep.subr.msk.mxu0 %vm28_vm0, %v23_v3  ;;  %200 = vmatprep.subr.msk.mxu1 %vm28_vm0, %v111_v4 }
   0x5   :  { %197 = vmatpush1.msk.msra.mxu0 %vm28_vm0, %v16_v0  ;;  %201 = vmatpush1.msk.msra.mxu1 %vm28_vm0, %v199_v1 }
   0x6   :  { %198 = vmatmul.mubr.msk.f32.vlgmr.msra.gmra.mrb[0].mxu0 %vm24_vm1, %v14_v7  ;;  %202 = vmatmul.mubr.msk.f32.vlgmr.msra.gmra.mrb[0].mxu1 %vm24_vm1, %v14_v7 }
  0x82   :  { %v20_v8 = vpop.permute.xlu0 %19 }
  0xd9   :  { %v99_v9 = vpop.f32.mrb[0].mxu0  ;;  %v182_v10 = vpop.f32.mrb[0].mxu1 }
  0xda   :  { %v100_v11 = vadd.f32 %v99_v9, %v20_v8  ;;  %v183_v12 = vadd.f32 %v182_v10, %v20_v8  ;;  %v101_v13 = vpop.f32.mrb[1].mxu0  ;;  %v184_v14 = vpop.f32.mrb[1].mxu1 }
  0xdb   :  { %v102_v15 = vadd.f32 %v101_v13, %v20_v8  ;;  %v185_v16 = vadd.f32 %v184_v14, %v20_v8 }
  0xdc   :  { %v104_v17 = vmax.f32 %v100_v11, 0.0  ;;  %v187_v18 = vmax.f32 %v183_v12, 0.0 }
  0xdd   :  { %v105_v19 = vmax.f32 %v102_v15, 0.0  ;;  %v188_v20 = vmax.f32 %v185_v16, 0.0 }
  0xde   :  { %106 = vst [vmem:[%s263_s3] sm:$0xff] %v104_v17  ;;  %203 = vst [vmem:[%s263_s3 + $0x10] sm:$0xff] %v187_v18 }
  0xdf   :  { %107 = vst [vmem:[%s263_s3 + $0x8] sm:$0xff] %v105_v19  ;;  %204 = vst [vmem:[%s263_s3 + $0x18] sm:$0xff] %v188_v20 }

</bundles_post_ra>
